<compile_context>
chip_gen: v5e
topology: v5e:2x2
jax: 0.10.0
libtpu: 0.0.40
codegen_flags: <defaults>
</compile_context>

<pallas_src>
import functools

import jax
import jax.numpy as jnp
from jax.experimental import pallas as pl
from jax.experimental.pallas import tpu as pltpu

HIDDEN = 30           # logical hidden width (matches nn.Linear(input_size, 30))
HPAD = 128            # hidden width padded to a full lane tile
LANE = 128            # padded fc2 output width used for in-VMEM compute
MAX_TB = 2048         # batch-tile cap (rows per grid step)


def _round_up(x, m):
    return ((x + m - 1) // m) * m


def _mlp_kernel(x_ref, w1_ref, b1_ref, w2_ref, b2_ref, o_ref):
    # x:  [TB, D_in], w1: [D_in, HPAD], b1: [1, HPAD],
    # w2: [HPAD, LANE], b2: [1, LANE], o: [TB, nb_action]
    x = x_ref[...]
    h = jnp.dot(x, w1_ref[...], preferred_element_type=jnp.float32,
                precision=jax.lax.Precision.HIGHEST) + b1_ref[...]
    h = jnp.maximum(h, 0.0)                                   # F.relu (full-lane)
    q = jnp.dot(h, w2_ref[...], preferred_element_type=jnp.float32,
                precision=jax.lax.Precision.HIGHEST) + b2_ref[...]
    # Store only the real nb_action columns (narrow HBM writeback).
    o_ref[...] = q[:, : o_ref.shape[1]].astype(o_ref.dtype)


def prepare_params(w1, b1, w2, b2):
    """One-time parameter prep (hoisted out of the forward path).

    w1: [HIDDEN, input_size], b1: [HIDDEN]   (torch nn.Linear layout)
    w2: [nb_action, HIDDEN],  b2: [nb_action]
    Returns pre-transposed, lane-padded params for network_forward.
    """
    nb_action = w2.shape[0]
    d_in = w1.shape[1]
    w1_t = jnp.asarray(w1, jnp.float32).T                       # [D_in, HIDDEN]
    b1_v = jnp.asarray(b1, jnp.float32).reshape(1, -1)          # [1, HIDDEN]
    w2_t = jnp.asarray(w2, jnp.float32).T                       # [HIDDEN, A]
    b2_v = jnp.asarray(b2, jnp.float32).reshape(1, -1)          # [1, A]
    # Zero-pad hidden dim to 128 and fc2 output to 128 lanes. Padded hidden
    # lanes see zero weights + zero bias -> relu(0) = 0, and padded w2 rows are
    # zero, so results are bit-identical to the unpadded math.
    w1_pad = jnp.zeros((d_in, HPAD), jnp.float32).at[:, :HIDDEN].set(w1_t)
    b1_pad = jnp.zeros((1, HPAD), jnp.float32).at[:, :HIDDEN].set(b1_v)
    w2_pad = jnp.zeros((HPAD, LANE), jnp.float32).at[:HIDDEN, :nb_action].set(w2_t)
    b2_pad = jnp.zeros((1, LANE), jnp.float32).at[:, :nb_action].set(b2_v)
    return w1_pad, b1_pad, w2_pad, b2_pad, nb_action


@functools.partial(jax.jit, static_argnames=("nb_action",))
def network_forward(state, w1_pad, b1_pad, w2_pad, b2_pad, nb_action):
    """Forward pass of Network as a single batch-tiled Pallas kernel.

    state: [B, input_size] float32
    (remaining args come from prepare_params)
    returns q_values: [B, nb_action] float32
    """
    state = jnp.asarray(state, jnp.float32)
    B, d_in = state.shape

    # Balanced batch tiles: at least cdiv(B, MAX_TB) tiles, and >= 2 tiles for
    # large batches so the "parallel" axis spans both TensorCores on v7x.
    num_tiles = max(pl.cdiv(B, MAX_TB), 2 if B >= 1024 else 1)
    tb = _round_up(pl.cdiv(B, num_tiles), 8)
    grid = (pl.cdiv(B, tb),)   # partial last block handled by Pallas masking

    out = pl.pallas_call(
        _mlp_kernel,
        out_shape=jax.ShapeDtypeStruct((B, nb_action), jnp.float32),
        grid_spec=pltpu.PrefetchScalarGridSpec(
            num_scalar_prefetch=0,
            grid=grid,
            in_specs=[
                pl.BlockSpec((tb, d_in), lambda i: (i, 0)),        # streamed state
                pl.BlockSpec((d_in, HPAD), lambda i: (0, 0)),      # resident weights
                pl.BlockSpec((1, HPAD), lambda i: (0, 0)),
                pl.BlockSpec((HPAD, LANE), lambda i: (0, 0)),
                pl.BlockSpec((1, LANE), lambda i: (0, 0)),
            ],
            out_specs=pl.BlockSpec((tb, nb_action), lambda i: (i, 0)),  # narrow output
        ),
        compiler_params=pltpu.CompilerParams(
            dimension_semantics=("parallel",),        # batch tiles across TCs (v7x)
            vmem_limit_bytes=32 * 1024 * 1024,        # safe on v7x (64 MiB physical)
        ),
    )(state, w1_pad, b1_pad, w2_pad, b2_pad)

    return out


def _init_linear(key, out_features, in_features):
    # Matches torch.nn.Linear default init: U(-1/sqrt(fan_in), 1/sqrt(fan_in))
    kw, kb = jax.random.split(key)
    bound = 1.0 / jnp.sqrt(jnp.float32(in_features))
    w = jax.random.uniform(kw, (out_features, in_features), jnp.float32,
                           minval=-bound, maxval=bound)
    b = jax.random.uniform(kb, (out_features,), jnp.float32,
                           minval=-bound, maxval=bound)
    return w, b


if __name__ == "__main__":
    # Shapes consistent with the module (the original project uses
    # input_size=5 sensor signals, nb_action=3).
    batch = 2
    input_size = 5
    nb_action = 3

    key = jax.random.PRNGKey(0)
    k_state, k_fc1, k_fc2 = jax.random.split(key, 3)

    state = jax.random.normal(k_state, (batch, input_size), jnp.float32)
    w1, b1 = _init_linear(k_fc1, HIDDEN, input_size)
    w2, b2 = _init_linear(k_fc2, nb_action, HIDDEN)

    # One-time parameter prep (transpose + lane padding) hoisted out of forward.
    w1_pad, b1_pad, w2_pad, b2_pad, nb_a = prepare_params(w1, b1, w2, b2)

    q = network_forward(state, w1_pad, b1_pad, w2_pad, b2_pad, nb_a)
    q = jax.block_until_ready(q)

    # Pure-JAX reference check (same math as the PyTorch forward), f32-exact.
    hi = jax.lax.Precision.HIGHEST
    ref_h = jnp.maximum(jnp.dot(state, w1.T, precision=hi) + b1, 0.0)
    ref = jnp.dot(ref_h, w2.T, precision=hi) + b2
    assert q.shape == (batch, nb_action)
    assert jnp.allclose(q, ref, atol=1e-5, rtol=1e-5)

    print("KERNEL_OK")
</pallas_src>

<mosaic_0001>
module attributes {stable_mosaic.version = 11 : i64} {
  func.func @_mlp_kernel(%arg0: i32, %arg1: memref<8x5xf32, #tpu.memory_space<vmem>>, %arg2: memref<5x128xf32, #tpu.memory_space<vmem>>, %arg3: memref<1x128xf32, #tpu.memory_space<vmem>>, %arg4: memref<128x128xf32, #tpu.memory_space<vmem>>, %arg5: memref<1x128xf32, #tpu.memory_space<vmem>>, %arg6: memref<8x3xf32, #tpu.memory_space<vmem>>) attributes {dimension_semantics = [#tpu.dimension_semantics<parallel>], iteration_bounds = array<i64: 1>, scalar_prefetch = 0 : i64, scratch_operands = 0 : i64, tpu.core_type = #tpu.core_type<tc>, window_params = [{transform_indices = @transform_0, window_bounds = array<i64: 8, 5>}, {pipeline_mode = #tpu.pipeline_mode<synchronous>, transform_indices = @transform_1, window_bounds = array<i64: 5, 128>}, {pipeline_mode = #tpu.pipeline_mode<synchronous>, transform_indices = @transform_2, window_bounds = array<i64: 1, 128>}, {pipeline_mode = #tpu.pipeline_mode<synchronous>, transform_indices = @transform_3, window_bounds = array<i64: 128, 128>}, {pipeline_mode = #tpu.pipeline_mode<synchronous>, transform_indices = @transform_4, window_bounds = array<i64: 1, 128>}, {transform_indices = @transform_5, window_bounds = array<i64: 8, 3>}]} {
    %c0 = arith.constant 0 : index
    %c0_0 = arith.constant 0 : index
    %0 = vector.load %arg1[%c0, %c0_0] : memref<8x5xf32, #tpu.memory_space<vmem>>, vector<8x5xf32>
    %c0_1 = arith.constant 0 : index
    %c0_2 = arith.constant 0 : index
    %1 = vector.load %arg2[%c0_1, %c0_2] : memref<5x128xf32, #tpu.memory_space<vmem>>, vector<5x128xf32>
    %cst = arith.constant dense<0.000000e+00> : vector<8x128xf32>
    %2 = tpu.matmul %0, %1, %cst {dimension_numbers = #tpu.dot_dimension_numbers<[1], [0], [0], [1], [0, 0, 1, 1], [], []>, precision = #tpu.contract_precision<fp32>} : vector<8x5xf32>, vector<5x128xf32>, vector<8x128xf32> -> vector<8x128xf32>
    %c0_3 = arith.constant 0 : index
    %c0_4 = arith.constant 0 : index
    %3 = vector.load %arg3[%c0_3, %c0_4] : memref<1x128xf32, #tpu.memory_space<vmem>>, vector<1x128xf32>
    %4 = vector.broadcast %3 : vector<1x128xf32> to vector<8x128xf32>
    %5 = arith.addf %2, %4 : vector<8x128xf32>
    %cst_5 = arith.constant 0.000000e+00 : f32
    %6 = vector.broadcast %cst_5 : f32 to vector<8x128xf32>
    %7 = arith.maximumf %5, %6 : vector<8x128xf32>
    %c0_6 = arith.constant 0 : index
    %c0_7 = arith.constant 0 : index
    %8 = vector.load %arg4[%c0_6, %c0_7] : memref<128x128xf32, #tpu.memory_space<vmem>>, vector<128x128xf32>
    %cst_8 = arith.constant dense<0.000000e+00> : vector<8x128xf32>
    %9 = tpu.matmul %7, %8, %cst_8 {dimension_numbers = #tpu.dot_dimension_numbers<[1], [0], [0], [1], [0, 0, 1, 1], [], []>, precision = #tpu.contract_precision<fp32>} : vector<8x128xf32>, vector<128x128xf32>, vector<8x128xf32> -> vector<8x128xf32>
    %c0_9 = arith.constant 0 : index
    %c0_10 = arith.constant 0 : index
    %10 = vector.load %arg5[%c0_9, %c0_10] : memref<1x128xf32, #tpu.memory_space<vmem>>, vector<1x128xf32>
    %11 = vector.broadcast %10 : vector<1x128xf32> to vector<8x128xf32>
    %12 = arith.addf %9, %11 : vector<8x128xf32>
    %13 = vector.extract_strided_slice %12 {offsets = [0, 0], sizes = [8, 3], strides = [1, 1]} : vector<8x128xf32> to vector<8x3xf32>
    %c0_11 = arith.constant 0 : index
    %c0_12 = arith.constant 0 : index
    %14 = vector.load %arg6[%c0_11, %c0_12] : memref<8x3xf32, #tpu.memory_space<vmem>>, vector<8x3xf32>
    tpu.vector_store %arg6[%c0_11, %c0_12], %13 {strides = array<i32>} : memref<8x3xf32, #tpu.memory_space<vmem>>, vector<8x3xf32>,
    return
  }
  func.func @transform_0(%arg0: i32) -> (i32, i32) {
    %c0_i32 = arith.constant 0 : i32
    %c0_i32_0 = arith.constant 0 : i32
    return %arg0, %c0_i32 : i32, i32
  }
  func.func @transform_1(%arg0: i32) -> (i32, i32) {
    %c0_i32 = arith.constant 0 : i32
    %c0_i32_0 = arith.constant 0 : i32
    %c0_i32_1 = arith.constant 0 : i32
    return %c0_i32, %c0_i32_0 : i32, i32
  }
  func.func @transform_2(%arg0: i32) -> (i32, i32) {
    %c0_i32 = arith.constant 0 : i32
    %c0_i32_0 = arith.constant 0 : i32
    %c0_i32_1 = arith.constant 0 : i32
    return %c0_i32, %c0_i32_0 : i32, i32
  }
  func.func @transform_3(%arg0: i32) -> (i32, i32) {
    %c0_i32 = arith.constant 0 : i32
    %c0_i32_0 = arith.constant 0 : i32
    %c0_i32_1 = arith.constant 0 : i32
    return %c0_i32, %c0_i32_0 : i32, i32
  }
  func.func @transform_4(%arg0: i32) -> (i32, i32) {
    %c0_i32 = arith.constant 0 : i32
    %c0_i32_0 = arith.constant 0 : i32
    %c0_i32_1 = arith.constant 0 : i32
    return %c0_i32, %c0_i32_0 : i32, i32
  }
  func.func @transform_5(%arg0: i32) -> (i32, i32) {
    %c0_i32 = arith.constant 0 : i32
    %c0_i32_0 = arith.constant 0 : i32
    return %arg0, %c0_i32 : i32, i32
  }
}

</mosaic_0001>

<bundles_post_ra>
// kernel: network_forward.1
= control target key start
LH: loop header
LB: loop body
LE: loop exit
PB: predicated region body
PF: predicated region fallthrough
CT: control target
= control target key end

     0   :  { %10 = vsyncpa [#allocation3], 0  ;;  %s1030_s0 = inlined_call_operand.hbm [shape: f32[2,5], index: 0, kind: input, shape index: {}]   ;;  %s1031_s1 = inlined_call_operand.hbm [shape: f32[5,128], index: 1, kind: input, shape index: {}]   ;;  %s1032_s2 = inlined_call_operand.vmem [shape: f32[1,128], index: 2, kind: input, shape index: {}]   ;;  %s1033_s3 = inlined_call_operand.hbm [shape: f32[128,128], index: 3, kind: input, shape index: {}]   ;;  %s1034_s4 = inlined_call_operand.vmem [shape: f32[1,128], index: 4, kind: input, shape index: {}]   ;;  %s1035_s5 = inlined_call_operand.hbm [shape: f32[2,3], index: 5, kind: output, shape index: {}]  }
   0x1   :  { %11 = vsyncpa [#allocation6], 0 }
   0x2   :  { %12 = vsyncpa [#allocation4], 0  ;;  %s31_s20 = sshll.u32 %s1031_s1, 4  ;;  %s32_s20 = int_to_ptr.hbm [resolvable:$true] %s31_s20 }
   0x3   :  { %16 = vsyncadd [#allocation3], 96  ;;  %s722_s21 = smov [#allocation5]   ;;  %s17_s25 = sshll.u32 %s1030_s0, 4  ;;  %s18_s25 = int_to_ptr.hbm [resolvable:$true] %s17_s25 }
   0x4   :  { %s33_s22 = sshll.u32 %s722_s21, 4  ;;  %s723_s26 = smov [#allocation2]   ;;  %s34_s22 = int_to_ptr.vmem [resolvable:$true] %s33_s22 }
   0x5   :  { %36 = dma.hbm_to_vmem [thread:$0]  %s32_s20, 128, %s34_s22, [#allocation6]  }
   0x6   :  { %s19_s27 = sshll.u32 %s723_s26, 4  ;;  %s724_s28 = smov 32   ;;  %s20_s27 = int_to_ptr.vmem [resolvable:$true] %s19_s27 }
   0x7   :  { %s725_s29 = smov 2   ;;  %s43_s6 = sshll.u32 %s1033_s3, 4  ;;  %s44_s6 = int_to_ptr.hbm [resolvable:$true] %s43_s6 }
   0x8   :  { %25 = dma.hbm_to_vmem [thread:$0]  %s18_s25, 32, %s20_s27, [#allocation3], %s724_s28, %s724_s28, %s725_s29  }
   0x9   :  { %s726_s7 = smov [#allocation7]   ;;  %s727_s0 = smov 128  }
   0xa   :  { %s45_s8 = sshll.u32 %s726_s7, 4  ;;  %s728_s9 = smov 8   ;;  %s46_s8 = int_to_ptr.vmem [resolvable:$true] %s45_s8 }
   0xb   :  { %51 = dma.hbm_to_vmem [thread:$0]  %s44_s6, 2048, %s46_s8, [#allocation6], %s727_s0, %s727_s0, %s728_s9  }
   0xc   :  { %716 = dma.done.wait [#allocation3], 128  }
   0xd   :  { %717 = vsyncadd [#allocation3], 4294967168 }
   0xe   :  { %718 = dma.done.wait [#allocation6], 2176  }
   0xf   :  { %719 = vsyncadd [#allocation6], 4294965120  ;;  %vm76_vm0 = vcmask 1044480   ;;  %vm72_vm1 = vcmask 39936   ;;  %v67_v0 = vld [vmem:[#allocation5] sm:$0x1f] }
  0x10   :  { %v66_v1 = vld [vmem:[#allocation2] sm:$0xff]  ;;  %v242_v2 = vld [vmem:[#allocation7 + $0x78] sm:$0xff]  ;;  %v78_v3 = vsel %vm76_vm0, %v67_v0, 0  ;;  %v240_v7 = vld [vmem:[#allocation7 + $0x68] sm:$0xff]  ;;  %vm588_vm2 = vcmask 23552  }
  0x11   :  { %v74_v4 = vsel %vm72_vm1, %v66_v1, 0  ;;  %v772_v5 = vand.u32 4294901760, %v242_v2  ;;  %v241_v6 = vld [vmem:[#allocation7 + $0x70] sm:$0xff]  ;;  %v239_v8 = vld [vmem:[#allocation7 + $0x60] sm:$0xff]  ;;  %v774_v9 = vand.u32 4294901760, %v78_v3  ;;  %v780_v12 = vand.u32 4294901760, %v240_v7 }
  0x12   :  { %v776_v10 = vand.u32 4294901760, %v74_v4  ;;  %v778_v11 = vand.u32 4294901760, %v241_v6  ;;  %v238_v13 = vld [vmem:[#allocation7 + $0x58] sm:$0xff]  ;;  %v237_v14 = vld [vmem:[#allocation7 + $0x50] sm:$0xff]  ;;  %v785_v16 = vand.u32 4294901760, %v239_v8  ;;  %v236_v38 = vld [vmem:[#allocation7 + $0x48] sm:$0xff] }
  0x13   :  { %v783_v15 = vsub.f32 %v242_v2, %v772_v5  ;;  %248 = vmatpush.msra.mxu2 %v772_v5  ;;  %v788_v17 = vand.u32 4294901760, %v238_v13  ;;  %v790_v18 = vand.u32 4294901760, %v237_v14  ;;  %96 = vmatpush.msra.mxu0 %v774_v9  ;;  %v122_v20 = vsub.f32 %v78_v3, %v774_v9  ;;  %v235_v39 = vld [vmem:[#allocation7 + $0x40] sm:$0xff]  ;;  %v234_v43 = vld [vmem:[#allocation7 + $0x38] sm:$0xff]  ;;  %v233_v44 = vld [vmem:[#allocation7 + $0x30] sm:$0xff] }
  0x14   :  { %v794_v19 = vsub.f32 %v74_v4, %v776_v10  ;;  %v798_v21 = vsub.f32 %v241_v6, %v778_v11  ;;  %v801_v22 = vsub.f32 %v240_v7, %v780_v12  ;;  %v805_v24 = vsub.f32 %v239_v8, %v785_v16  ;;  %v232_v45 = vld [vmem:[#allocation7 + $0x28] sm:$0xff]  ;;  %v231_v52 = vld [vmem:[#allocation7 + $0x20] sm:$0xff]  ;;  %v230_v60 = vld [vmem:[#allocation7 + $0x18] sm:$0xff] }
  0x15   :  { %v290_v23 = vand.u32 4294901760, %v783_v15  ;;  %v808_v25 = vsub.f32 %v238_v13, %v788_v17  ;;  %250 = vmatpush.msra.mxu2 %v778_v11  ;;  %v812_v26 = vsub.f32 %v237_v14, %v790_v18  ;;  %149 = vmatpush.msrb.mxu0 %v122_v20  ;;  %v123_v28 = vand.u32 4294901760, %v122_v20  ;;  %v229_v3 = vld [vmem:[#allocation7 + $0x10] sm:$0xff]  ;;  %v228_v13 = vld [vmem:[#allocation7 + $0x8] sm:$0xff] }
  0x16   :  { %v99_v27 = vand.u32 4294901760, %v794_v19  ;;  %v296_v29 = vand.u32 4294901760, %v798_v21  ;;  %v302_v30 = vand.u32 4294901760, %v801_v22  ;;  %v308_v32 = vand.u32 4294901760, %v805_v24 }
  0x17   :  { %v291_v31 = vsub.f32 %v783_v15, %v290_v23  ;;  %v314_v33 = vand.u32 4294901760, %v808_v25  ;;  %252 = vmatpush.msra.mxu2 %v780_v12  ;;  %v124_v35 = vsub.f32 %v122_v20, %v123_v28  ;;  %v320_v42 = vand.u32 4294901760, %v812_v26 }
  0x18   :  { %v100_v34 = vsub.f32 %v794_v19, %v99_v27  ;;  %v297_v36 = vsub.f32 %v798_v21, %v296_v29  ;;  %v303_v37 = vsub.f32 %v801_v22, %v302_v30  ;;  %v309_v41 = vsub.f32 %v805_v24, %v308_v32 }
  0x19   :  { %v292_v40 = vand.u32 4294901760, %v291_v31  ;;  %254 = vmatpush.msra.mxu2 %v785_v16  ;;  %v125_v47 = vand.u32 4294901760, %v124_v35  ;;  %v315_v50 = vsub.f32 %v808_v25, %v314_v33  ;;  %v840_v51 = vand.u32 4294901760, %v236_v38 }
  0x1a   :  { %v101_v46 = vand.u32 4294901760, %v100_v34  ;;  %v298_v48 = vand.u32 4294901760, %v297_v36  ;;  %v304_v49 = vand.u32 4294901760, %v303_v37  ;;  %v843_v53 = vand.u32 4294901760, %v235_v39 }
  0x1b   :  { %293 = vmatpush.msra.mxu3 %v292_v40  ;;  %256 = vmatpush.msra.mxu2 %v788_v17  ;;  %v845_v54 = vand.u32 4294901760, %v234_v43  ;;  %v847_v55 = vand.u32 4294901760, %v233_v44  ;;  %v849_v56 = vand.u32 4294901760, %v232_v45  ;;  %v310_v57 = vand.u32 4294901760, %v309_v41 }
  0x1c   :  { %102 = vmatmul.f32.vlgmr.msra.gmra.mxu0 %v101_v46  ;;  %126 = vmatpush.msra.mxu1 %v125_v47  ;;  %v321_v58 = vsub.f32 %v812_v26, %v320_v42  ;;  %v856_v59 = vsub.f32 %v236_v38, %v840_v51  ;;  %v860_v61 = vsub.f32 %v235_v39, %v843_v53  ;;  %v868_v0 = vand.u32 4294901760, %v231_v52 }
  0x1d   :  { %128 = vmatmul.f32.vlgmr.msra.gmra.mxu1 %v776_v10  ;;  %198 = vmatpush.msra.mxu0 %v123_v28  ;;  %v863_v62 = vsub.f32 %v234_v43, %v845_v54  ;;  %v866_v63 = vsub.f32 %v233_v44, %v847_v55  ;;  %v316_v1 = vand.u32 4294901760, %v315_v50  ;;  %v876_v7 = vsub.f32 %v232_v45, %v849_v56 }
  0x1e   :  { %172 = vmatpush.msrb.mxu1 %v774_v9  ;;  %299 = vmatpush.msra.mxu3 %v298_v48  ;;  %v326_v2 = vand.u32 4294901760, %v856_v59  ;;  %v332_v4 = vand.u32 4294901760, %v860_v61  ;;  %v878_v8 = vand.u32 4294901760, %v230_v60  ;;  %v322_v14 = vand.u32 4294901760, %v321_v58 }
  0x1f   :  { %258 = vmatpush.msra.mxu2 %v790_v18  ;;  %v338_v6 = vand.u32 4294901760, %v863_v62  ;;  %v344_v28 = vand.u32 4294901760, %v866_v63  ;;  %v889_v31 = vsub.f32 %v231_v52, %v868_v0  ;;  %v891_v34 = vand.u32 4294901760, %v229_v3 }
  0x20   :  { %220 = vmatpush.msra.mxu1 %v774_v9  ;;  %305 = vmatpush.msra.mxu3 %v304_v49  ;;  %v327_v9 = vsub.f32 %v856_v59, %v326_v2  ;;  %v333_v20 = vsub.f32 %v860_v61, %v332_v4  ;;  %v894_v35 = vand.u32 4294901760, %v228_v13  ;;  %v350_v38 = vand.u32 4294901760, %v876_v7 }
  0x21   :  { %260 = vmatpush.msra.mxu2 %v840_v51  ;;  %v339_v37 = vsub.f32 %v863_v62, %v338_v6  ;;  %v902_v39 = vsub.f32 %v230_v60, %v878_v8  ;;  %v345_v41 = vsub.f32 %v866_v63, %v344_v28  ;;  %v356_v43 = vand.u32 4294901760, %v889_v31 }
  0x22   :  { %311 = vmatpush.msra.mxu3 %v310_v57  ;;  %v328_v36 = vand.u32 4294901760, %v327_v9  ;;  %v334_v40 = vand.u32 4294901760, %v333_v20  ;;  %v913_v44 = vsub.f32 %v229_v3, %v891_v34  ;;  %v923_v46 = vsub.f32 %v228_v13, %v894_v35 }
  0x23   :  { %262 = vmatpush.msra.mxu2 %v843_v53  ;;  %v362_v45 = vand.u32 4294901760, %v902_v39  ;;  %v346_v47 = vand.u32 4294901760, %v345_v41  ;;  %v357_v48 = vsub.f32 %v889_v31, %v356_v43 }
  0x24   :  { %152 = vmatmul.f32.vlgmr.msrb.gmra.mxu0 %v794_v19  ;;  %317 = vmatpush.msra.mxu3 %v316_v1  ;;  %v340_v19 = vand.u32 4294901760, %v339_v37  ;;  %v368_v49 = vand.u32 4294901760, %v913_v44  ;;  %v374_v57 = vand.u32 4294901760, %v923_v46 }
  0x25   :  { %176 = vmatmul.f32.vlgmr.msrb.gmra.mxu1 %v99_v27  ;;  %264 = vmatpush.msra.mxu2 %v845_v54  ;;  %v351_v27 = vsub.f32 %v876_v7, %v350_v38  ;;  %v363_v52 = vsub.f32 %v902_v39, %v362_v45  ;;  %v358_v58 = vand.u32 4294901760, %v357_v48 }
  0x26   :  { %323 = vmatpush.msra.mxu3 %v322_v14  ;;  %391 = vmatpush.msrb.mxu0 %v783_v15  ;;  %v369_v60 = vsub.f32 %v913_v44, %v368_v49  ;;  %v227_v14 = vld [vmem:[#allocation7] sm:$0xff] }
  0x27   :  { %266 = vmatpush.msra.mxu2 %v847_v55  ;;  %444 = vmatpush.msrb.mxu1 %v772_v5  ;;  %v352_v50 = vand.u32 4294901760, %v351_v27  ;;  %v364_v1 = vand.u32 4294901760, %v363_v52  ;;  %v277_v9 = vand.u32 4294901760, %v227_v14 }
  0x28   :  { %329 = vmatpush.msra.mxu3 %v328_v36  ;;  %394 = vmatpush.msrb.mxu0 %v798_v21  ;;  %v370_v3 = vand.u32 4294901760, %v369_v60 }
  0x29   :  { %268 = vmatpush.msra.mxu2 %v849_v56  ;;  %446 = vmatpush.msrb.mxu1 %v778_v11  ;;  %v379_v20 = vsub.f32 %v227_v14, %v277_v9 }
  0x2a   :  { %335 = vmatpush.msra.mxu3 %v334_v40  ;;  %397 = vmatpush.msrb.mxu0 %v801_v22 }
  0x2b   :  { %270 = vmatpush.msra.mxu2 %v868_v0  ;;  %448 = vmatpush.msrb.mxu1 %v780_v12  ;;  %v380_v36 = vand.u32 4294901760, %v379_v20 }
  0x2c   :  { %200 = vmatmul.f32.vlgmr.msra.gmra.mxu0 %v776_v10  ;;  %341 = vmatpush.msra.mxu3 %v340_v19 }
  0x2d   :  { %222 = vmatmul.f32.vlgmr.msra.gmra.mxu1 %v776_v10  ;;  %400 = vmatpush.msrb.mxu0 %v805_v24  ;;  %v375_v10 = vsub.f32 %v923_v46, %v374_v57  ;;  %v381_v37 = vsub.f32 %v379_v20, %v380_v36 }
  0x2e   :  { %347 = vmatpush.msra.mxu3 %v346_v47  ;;  %272 = vmatpush.msra.mxu2 %v878_v8 }
  0x2f   :  { %403 = vmatpush.msrb.mxu0 %v808_v25  ;;  %450 = vmatpush.msrb.mxu1 %v785_v16  ;;  %v376_v13 = vand.u32 4294901760, %v375_v10  ;;  %v382_v40 = vand.u32 4294901760, %v381_v37 }
  0x30   :  { %353 = vmatpush.msra.mxu3 %v352_v50  ;;  %274 = vmatpush.msra.mxu2 %v891_v34 }
  0x31   :  { %406 = vmatpush.msrb.mxu0 %v812_v26  ;;  %452 = vmatpush.msrb.mxu1 %v788_v17 }
  0x32   :  { %359 = vmatpush.msra.mxu3 %v358_v58  ;;  %276 = vmatpush.msra.mxu2 %v894_v35 }
  0x33   :  { %409 = vmatpush.msrb.mxu0 %v856_v59  ;;  %454 = vmatpush.msrb.mxu1 %v790_v18 }
  0x34   :  { %365 = vmatpush.msra.mxu3 %v364_v1  ;;  %278 = vmatpush.msra.mxu2 %v277_v9 }
  0x35   :  { %412 = vmatpush.msrb.mxu0 %v860_v61  ;;  %456 = vmatpush.msrb.mxu1 %v840_v51 }
  0x36   :  { %371 = vmatpush.msra.mxu3 %v370_v3  ;;  %485 = vmatpush.msrb.mxu2 %v290_v23 }
  0x37   :  { %415 = vmatpush.msrb.mxu0 %v863_v62  ;;  %458 = vmatpush.msrb.mxu1 %v843_v53 }
  0x38   :  { %377 = vmatpush.msra.mxu3 %v376_v13  ;;  %489 = vmatpush.msrb.mxu2 %v296_v29 }
  0x39   :  { %418 = vmatpush.msrb.mxu0 %v866_v63  ;;  %460 = vmatpush.msrb.mxu1 %v845_v54 }
  0x3a   :  { %493 = vmatpush.msrb.mxu2 %v302_v30  ;;  %383 = vmatpush.msra.mxu3 %v382_v40 }
  0x3b   :  { %421 = vmatpush.msrb.mxu0 %v876_v7  ;;  %462 = vmatpush.msrb.mxu1 %v847_v55 }
  0x3c   :  { %497 = vmatpush.msrb.mxu2 %v308_v32  ;;  %552 = vmatpush.msrb.mxu3 %v772_v5 }
  0x3d   :  { %424 = vmatpush.msrb.mxu0 %v889_v31  ;;  %464 = vmatpush.msrb.mxu1 %v849_v56 }
  0x3e   :  { %501 = vmatpush.msrb.mxu2 %v314_v33  ;;  %554 = vmatpush.msrb.mxu3 %v778_v11  ;;  %v618_v11 = vld [vmem:[%s1032_s2] ss:$0 sm:$0xff] }
  0x3f   :  { %427 = vmatpush.msrb.mxu0 %v902_v39  ;;  %466 = vmatpush.msrb.mxu1 %v868_v0 }
  0x40   :  { %505 = vmatpush.msrb.mxu2 %v320_v42  ;;  %556 = vmatpush.msrb.mxu3 %v780_v12 }
  0x41   :  { %430 = vmatpush.msrb.mxu0 %v913_v44  ;;  %468 = vmatpush.msrb.mxu1 %v878_v8 }
  0x42   :  { %509 = vmatpush.msrb.mxu2 %v326_v2  ;;  %558 = vmatpush.msrb.mxu3 %v785_v16 }
  0x43   :  { %433 = vmatpush.msrb.mxu0 %v923_v46  ;;  %470 = vmatpush.msrb.mxu1 %v891_v34 }
  0x44   :  { %513 = vmatpush.msrb.mxu2 %v332_v4  ;;  %560 = vmatpush.msrb.mxu3 %v788_v17 }
  0x45   :  { %472 = vmatpush.msrb.mxu1 %v894_v35  ;;  %436 = vmatpush.msrb.mxu0 %v379_v20 }
  0x46   :  { %517 = vmatpush.msrb.mxu2 %v338_v6  ;;  %562 = vmatpush.msrb.mxu3 %v790_v18 }
  0x47   :  { %474 = vmatpush.msrb.mxu1 %v277_v9 }
  0x48   :  { %521 = vmatpush.msrb.mxu2 %v344_v28  ;;  %564 = vmatpush.msrb.mxu3 %v840_v51 }
  0x4a   :  { %525 = vmatpush.msrb.mxu2 %v350_v38  ;;  %566 = vmatpush.msrb.mxu3 %v843_v53  ;;  %v619_v53 = vld [vmem:[%s1034_s4] ss:$0 sm:$0xff] }
  0x4c   :  { %529 = vmatpush.msrb.mxu2 %v356_v43  ;;  %568 = vmatpush.msrb.mxu3 %v845_v54 }
  0x4e   :  { %533 = vmatpush.msrb.mxu2 %v362_v45  ;;  %570 = vmatpush.msrb.mxu3 %v847_v55 }
  0x50   :  { %537 = vmatpush.msrb.mxu2 %v368_v49  ;;  %572 = vmatpush.msrb.mxu3 %v849_v56 }
  0x52   :  { %541 = vmatpush.msrb.mxu2 %v374_v57  ;;  %574 = vmatpush.msrb.mxu3 %v868_v0 }
  0x54   :  { %545 = vmatpush.msrb.mxu2 %v380_v36  ;;  %576 = vmatpush.msrb.mxu3 %v878_v8 }
  0x56   :  { %578 = vmatpush.msrb.mxu3 %v891_v34 }
  0x58   :  { %580 = vmatpush.msrb.mxu3 %v894_v35 }
  0x5a   :  { %582 = vmatpush.msrb.mxu3 %v277_v9 }
  0x99   :  { %v103_v5 = vpop.f32.mrf.mxu0 }
  0x9a   :  { %v129_v12 = vpop.f32.mrf.mxu1  ;;  %v104_v15 = vadd.f32 %v618_v11, %v103_v5 }
  0x9c   :  { %v130_v17 = vadd.f32 %v129_v12, %v104_v15 }
  0xa1   :  { %v153_v16 = vpop.f32.mrf.mxu0 }
  0xa2   :  { %v177_v18 = vpop.f32.mrf.mxu1  ;;  %v154_v21 = vadd.f32 %v153_v16, %v130_v17 }
  0xa4   :  { %v178_v22 = vadd.f32 %v177_v18, %v154_v21 }
  0xa9   :  { %v201_v23 = vpop.f32.mrf.mxu0 }
  0xaa   :  { %v202_v24 = vadd.f32 %v201_v23, %v178_v22  ;;  %v223_v25 = vpop.f32.mrf.mxu1 }
  0xac   :  { %v224_v26 = vadd.f32 %v223_v25, %v202_v24 }
  0xae   :  { %v226_v29 = vmax.f32 %v224_v26, 0.0 }
  0xb0   :  { %v279_v30 = vand.u32 4294901760, %v226_v29 }
  0xb2   :  { %v280_v32 = vsub.f32 %v226_v29, %v279_v30  ;;  %385 = vmatmul.f32.vlgmr.msra.gmra.mxu3 %v279_v30 }
  0xb4   :  { %439 = vmatmul.f32.vlgmr.msrb.gmra.mxu0 %v280_v32  ;;  %v281_v33 = vand.u32 4294901760, %v280_v32 }
  0xb6   :  { %478 = vmatmul.f32.vlgmr.msrb.gmra.mxu1 %v281_v33  ;;  %v282_v42 = vsub.f32 %v280_v32, %v281_v33 }
  0xb8   :  { %v283_v51 = vand.u32 4294901760, %v282_v42 }
  0xba   :  { %284 = vmatmul.f32.vlgmr.msra.gmra.mxu2 %v283_v51  ;;  %584 = vmatmul.f32.vlgmr.msrb.gmra.mxu3 %v279_v30 }
  0xc2   :  { %547 = vmatmul.f32.vlgmr.msrb.gmra.mxu2 %v279_v30 }
 0x131   :  { %v440_v61 = vpop.f32.mrf.mxu0 }
 0x133   :  { %v479_v63 = vpop.f32.mrf.mxu1 }
 0x135   :  { %v386_v54 = vpop.f32.mrf.mxu3 }
 0x13d   :  { %v285_v55 = vpop.f32.mrf.mxu2  ;;  %v585_v6 = vpop.f32.mrf.mxu3 }
 0x13e   :  { %v286_v56 = vadd.f32 %v619_v53, %v285_v55 }
 0x140   :  { %v387_v59 = vadd.f32 %v386_v54, %v286_v56 }
 0x142   :  { %v441_v62 = vadd.f32 %v440_v61, %v387_v59 }
 0x144   :  { %v480_v0 = vadd.f32 %v479_v63, %v441_v62 }
 0x145   :  { %v548_v2 = vpop.f32.mrf.mxu2 }
 0x146   :  { %v549_v4 = vadd.f32 %v548_v2, %v480_v0 }
 0x148   :  { %v586_v7 = vadd.f32 %v585_v6, %v549_v4 }
 0x14a   :  { %589 = vst.msk [vmem:[#allocation8] sm:$0xff] %vm588_vm2, %v586_v7 }
 0x14b   :  { %593 = vsyncadd [#allocation4], 96  ;;  %s596_s14 = sshll.u32 %s1035_s5, 4  ;;  %s729_s4 = smov [#allocation8]   ;;  %s597_s14 = int_to_ptr.hbm [resolvable:$true] %s596_s14 }
 0x14c   :  { %s594_s15 = sshll.u32 %s729_s4, 4  ;;  %s595_s15 = int_to_ptr.vmem [resolvable:$true] %s594_s15 }
 0x14d   :  { %602 = dma.vmem_to_hbm [thread:$0]  %s595_s15, 32, %s597_s14, [#allocation4], %s724_s28, %s724_s28, %s725_s29  }
 0x14e   :  { %720 = dma.done.wait [#allocation4], 128  }
 0x14f   :  { %721 = vsyncadd [#allocation4], 4294967168 }
 0x150   :  { %607 = vsyncpa [#allocation3], 1 }
 0x151   :  { %608 = vsyncpa [#allocation6], 1 }
 0x152   :  { %609 = vsyncpa [#allocation4], 1 }

</bundles_post_ra>
